<compile_context>
chip_gen: v7x
topology: tpu7x:2x2x1
jax: 0.10.0
libtpu: 0.0.40
codegen_flags: <defaults>
</compile_context>

<pallas_src>
import numpy as np
import jax
import jax.numpy as jnp
from jax.experimental import pallas as pl
from jax.experimental.pallas import tpu as pltpu


# ----------------------------------------------------------------------------
# Operator construction (x-independent glue, plain JAX / numpy)
# ----------------------------------------------------------------------------
def _box_blur_1d(n: int) -> np.ndarray:
    """1-D 3-tap box blur with 'reflect' padding (kornia box_blur default)."""
    m = np.zeros((n, n), np.float32)
    for o in range(n):
        for d in (-1, 0, 1):
            i = o + d
            if i < 0:
                i = -i
            if i >= n:
                i = 2 * n - 2 - i
            m[o, i] += 1.0 / 3.0
    return m


def _flip_1d(n: int) -> np.ndarray:
    return np.eye(n, dtype=np.float32)[::-1].copy()


def _rotation_taps(angle_deg, H: int, W: int):
    """4-tap bilinear inverse-rotation taps.

    Returns (idx, val), each (4, HW): output pixel o gathers val[t, o] * x[idx[t, o]].
    Out-of-image taps get val = 0 (zeros padding outside the image).
    """
    theta = angle_deg * jnp.float32(np.pi / 180.0)
    cy = (H - 1) / 2.0
    cx = (W - 1) / 2.0
    ys, xs = jnp.meshgrid(jnp.arange(H, dtype=jnp.float32),
                          jnp.arange(W, dtype=jnp.float32), indexing="ij")
    xo = xs.reshape(-1) - cx
    yo = ys.reshape(-1) - cy
    cos, sin = jnp.cos(theta), jnp.sin(theta)
    # inverse-map output pixel -> source location
    x_src = cos * xo + sin * yo + cx
    y_src = -sin * xo + cos * yo + cy
    x0 = jnp.floor(x_src)
    y0 = jnp.floor(y_src)
    wx = x_src - x0
    wy = y_src - y0
    HW = H * W
    idxs, vals = [], []
    for dy, dx, w in ((0, 0, (1 - wy) * (1 - wx)),
                      (0, 1, (1 - wy) * wx),
                      (1, 0, wy * (1 - wx)),
                      (1, 1, wy * wx)):
        xi = x0 + dx
        yi = y0 + dy
        valid = ((xi >= 0) & (xi < W) & (yi >= 0) & (yi < H)).astype(jnp.float32)
        idx = jnp.clip((yi * W + xi).astype(jnp.int32), 0, HW - 1)
        idxs.append(idx)
        vals.append(w * valid)
    return jnp.stack(idxs), jnp.stack(vals)


def _build_mixture(weights, key, B, H, W):
    """Per-sample scalar coefficients and combined linear operator (transposed)."""
    HW = H * W
    probs = jnp.array([0.0, 0.2, 0.4, 0.6, 0.8], jnp.float32)
    degs = jnp.array([0.0, 45.0, 90.0, 135.0, 180.0, 225.0, 270.0], jnp.float32)

    k_blur, k_inv, k_h, k_v, k_rot = jax.random.split(key, 5)
    m_blur = (jax.random.uniform(k_blur, (B, 5)) < probs).astype(jnp.float32)
    m_inv = (jax.random.uniform(k_inv, (B, 5)) < probs).astype(jnp.float32)
    m_h = (jax.random.uniform(k_h, (B, 5)) < probs).astype(jnp.float32)
    m_v = (jax.random.uniform(k_v, (B, 5)) < probs).astype(jnp.float32)
    angles = jax.random.uniform(k_rot, (B, 7), minval=-1.0, maxval=1.0) * degs

    # weight layout follows DA_2D_PRIMITIVES ordering
    w_id = weights[1]
    w_blur = weights[2:7]
    w_inv = weights[7:12]
    w_h = weights[12:17]
    w_v = weights[17:22]
    w_rot = weights[22:29]

    # invert(x) = 1 - x when applied  ->  constant term + (-x) term
    c_x = (w_id
           + jnp.sum(w_blur * (1.0 - m_blur), axis=1)
           + jnp.sum(w_inv * (1.0 - 2.0 * m_inv), axis=1)
           + jnp.sum(w_h * (1.0 - m_h), axis=1)
           + jnp.sum(w_v * (1.0 - m_v), axis=1))              # (B,)
    c_const = jnp.sum(w_inv * m_inv, axis=1)                  # (B,)
    c_blur = jnp.sum(w_blur * m_blur, axis=1)                 # (B,)
    c_h = jnp.sum(w_h * m_h, axis=1)                          # (B,)
    c_v = jnp.sum(w_v * m_v, axis=1)                          # (B,)

    blur_mat = jnp.asarray(np.kron(_box_blur_1d(H), _box_blur_1d(W)))       # (HW,HW)
    ph = jnp.asarray(np.kron(np.eye(H, dtype=np.float32), _flip_1d(W)))     # hflip
    pv = jnp.asarray(np.kron(_flip_1d(H), np.eye(W, dtype=np.float32)))     # vflip

    # rotation mixture via scatter-add of bilinear taps (no (B,7,HW,HW) tensor)
    taps_idx, taps_val = jax.vmap(jax.vmap(lambda a: _rotation_taps(a, H, W)))(angles)
    # taps_idx/val: (B, 7, 4, HW); fold the architecture weights in now
    taps_val = taps_val * w_rot[None, :, None, None]
    rows = jnp.broadcast_to(jnp.arange(HW, dtype=jnp.int32)[None, None, :], (7, 4, HW))

    def _scatter_one(idx_b, val_b):
        return jnp.zeros((HW, HW), jnp.float32).at[rows, idx_b].add(val_b)

    R_mix = jax.vmap(_scatter_one)(taps_idx, taps_val)        # (B, HW, HW)

    M = (c_blur[:, None, None] * blur_mat[None]
         + c_h[:, None, None] * ph[None]
         + c_v[:, None, None] * pv[None]
         + R_mix)                                             # out_flat = M @ in_flat
    M_T = jnp.swapaxes(M, 1, 2)                               # for row-major x @ M_T
    coefs = jnp.stack([c_x, c_const], axis=1).astype(jnp.float32)   # (B, 2)
    return coefs, M_T.astype(jnp.float32)


# ----------------------------------------------------------------------------
# Pallas kernel: per-sample  out = c_x * x + c_const + x @ M_T
#   grid = (B // BT, HW // TN); BT samples per step, TN output columns per step.
# ----------------------------------------------------------------------------
def _mix_kernel(coefs_ref, xf_ref, mt_ref, o_ref):
    bb = pl.program_id(0)
    nb = pl.program_id(1)
    bt = xf_ref.shape[0]
    tn = o_ref.shape[2]
    col0 = pl.multiple_of(nb * tn, 128)      # TN is 128-multiple or full extent
    for i in range(bt):                      # static unroll, bt <= 8
        b = bb * bt + i
        c_x = coefs_ref[2 * b]               # SMEM scalars (flattened 1-D)
        c_const = coefs_ref[2 * b + 1]
        x_full = xf_ref[i]                   # (C, HW)  bf16, full K
        # MXU: bf16 x bf16 -> f32 accumulation
        lin = jnp.dot(x_full, mt_ref[i], preferred_element_type=jnp.float32)  # (C, tn)
        # affine term in f32, on the same output columns as this N tile
        x_tile = xf_ref[i, :, pl.ds(col0, tn)].astype(jnp.float32)
        o_ref[i] = c_x * x_tile + c_const + lin


def _pick_tiles(B: int, C: int, HW: int):
    """Lane-dense N tile and per-step sample count under a VMEM budget."""
    if HW <= 1024:
        TN = HW                                   # full extent, single N step
    else:
        TN = HW
        for cand in (1024, 512, 256, 128):
            if HW % cand == 0:
                TN = cand
                break
    budget = 24 << 20                             # ~24 MiB for double-buffered blocks
    BT = 1
    for bt in (8, 4, 2, 1):
        if B % bt != 0:
            continue
        blk = bt * (C * HW * 2 + HW * TN * 2 + C * TN * 4)
        if 2 * blk <= budget:
            BT = bt
            break
    return BT, TN


def _da_mixed_op_impl(x, weights, key):
    """x: (B, C, H, W) float32 NCHW; weights: (29,) float32."""
    B, C, H, W = x.shape
    HW = H * W
    coefs, M_T = _build_mixture(weights, key, B, H, W)

    # bf16 streaming operands (f32 accumulation inside the kernel)
    xf = x.reshape(B, C, HW).astype(jnp.bfloat16)
    mt = M_T.astype(jnp.bfloat16)

    BT, TN = _pick_tiles(B, C, HW)

    # explicit scoped-VMEM budget: double-buffered blocks + headroom
    block_bytes = BT * (C * HW * 2 + HW * TN * 2 + C * TN * 4)
    vmem_limit = int(min(max(4 * block_bytes + (8 << 20), 16 << 20), 48 << 20))

    out_flat = pl.pallas_call(
        _mix_kernel,
        out_shape=jax.ShapeDtypeStruct((B, C, HW), jnp.float32),
        grid_spec=pltpu.PrefetchScalarGridSpec(
            num_scalar_prefetch=1,               # coefs -> SMEM
            grid=(B // BT, HW // TN),
            in_specs=[
                pl.BlockSpec((BT, C, HW), lambda bb, nb, coefs: (bb, 0, 0)),
                pl.BlockSpec((BT, HW, TN), lambda bb, nb, coefs: (bb, 0, nb)),
            ],
            out_specs=pl.BlockSpec((BT, C, TN), lambda bb, nb, coefs: (bb, 0, nb)),
        ),
        compiler_params=pltpu.CompilerParams(
            dimension_semantics=("parallel", "parallel"),
            vmem_limit_bytes=vmem_limit),
    )(coefs.reshape(-1), xf, mt)
    return out_flat.reshape(B, C, H, W)


# jit the whole forward so operator construction + pallas_call compile together
da_mixed_op = jax.jit(_da_mixed_op_impl)


# ----------------------------------------------------------------------------
if __name__ == "__main__":
    key = jax.random.PRNGKey(0)
    kx, kw, kaug = jax.random.split(key, 3)

    B, C, H, W = 2, 4, 16, 16
    x = jax.random.uniform(kx, (B, C, H, W), dtype=jnp.float32)      # images in [0,1]
    weights = jax.nn.softmax(jax.random.normal(kw, (29,), dtype=jnp.float32))

    out = da_mixed_op(x, weights, kaug)
    out = jax.block_until_ready(out)
    assert out.shape == (B, C, H, W) and out.dtype == jnp.float32

    # --- check 1: kernel math vs a plain-JAX recomputation with the SAME
    #              bf16-rounded operands (tight tolerance) -------------------
    coefs, M_T = _build_mixture(weights, kaug, B, H, W)
    xf_bf = x.reshape(B, C, H * W).astype(jnp.bfloat16).astype(jnp.float32)
    mt_bf = M_T.astype(jnp.bfloat16).astype(jnp.float32)
    ref_bf = (coefs[:, 0][:, None, None] * xf_bf
              + coefs[:, 1][:, None, None]
              + jnp.einsum("bci,bio->bco", xf_bf, mt_bf)).reshape(B, C, H, W)
    np.testing.assert_allclose(np.asarray(out), np.asarray(ref_bf),
                               atol=1e-3, rtol=1e-3)

    # --- check 2: full-precision f32 mixture (loose tolerance; quantization
    #              of bf16 streaming operands only) --------------------------
    xf_f32 = x.reshape(B, C, H * W)
    ref_f32 = (coefs[:, 0][:, None, None] * xf_f32
               + coefs[:, 1][:, None, None]
               + jnp.einsum("bci,bio->bco", xf_f32, M_T)).reshape(B, C, H, W)
    np.testing.assert_allclose(np.asarray(out), np.asarray(ref_f32),
                               atol=2e-2, rtol=2e-2)

    print("KERNEL_OK")
</pallas_src>

<mosaic_0001>
module attributes {stable_mosaic.version = 11 : i64} {
  func.func private @main(%arg0: i32) attributes {dimension_semantics = [#tpu.dimension_semantics<core_parallel>], iteration_bounds = array<i64: 2>, tpu.core_type = #tpu.core_type<sc_scalar_subcore>, window_params = []} {
    return
  }
}

module attributes {stable_mosaic.version = 11 : i64} {
  func.func private @main(%arg0: i32) attributes {dimension_semantics = [#tpu.dimension_semantics<core_parallel>], iteration_bounds = array<i64: 2>, tpu.core_type = #tpu.core_type<sc_scalar_subcore>, window_params = []} {
    return
  }
}

module attributes {stable_mosaic.version = 11 : i64} {
  func.func @_mix_kernel(%arg0: i32, %arg1: i32, %arg2: memref<4xf32, #tpu.memory_space<smem>>, %arg3: memref<2x4x256xbf16, #tpu.memory_space<vmem>>, %arg4: memref<2x256x256xbf16, #tpu.memory_space<vmem>>, %arg5: memref<2x4x256xf32, #tpu.memory_space<vmem>>) attributes {dimension_semantics = [#tpu.dimension_semantics<parallel>, #tpu.dimension_semantics<parallel>], iteration_bounds = array<i64: 1, 1>, scalar_prefetch = 1 : i64, scratch_operands = 0 : i64, tpu.core_type = #tpu.core_type<tc>, window_params = [{transform_indices = @transform_0, window_bounds = array<i64: 2, 4, 256>}, {transform_indices = @transform_1, window_bounds = array<i64: 2, 256, 256>}, {transform_indices = @transform_2, window_bounds = array<i64: 2, 4, 256>}]} {
    %c256_i32 = arith.constant 256 : i32
    %0 = arith.muli %arg1, %c256_i32 : i32
    %1 = tpu.assume_multiple %0, 128 : i32
    %c2_i32 = arith.constant 2 : i32
    %2 = arith.muli %arg0, %c2_i32 : i32
    %c0_i32 = arith.constant 0 : i32
    %3 = arith.addi %2, %c0_i32 : i32
    %c2_i32_0 = arith.constant 2 : i32
    %4 = arith.muli %c2_i32_0, %3 : i32
    %5 = arith.index_cast %4 : i32 to index
    %6 = memref.load %arg2[%5] : memref<4xf32, #tpu.memory_space<smem>>
    %c2_i32_1 = arith.constant 2 : i32
    %7 = arith.muli %c2_i32_1, %3 : i32
    %c1_i32 = arith.constant 1 : i32
    %8 = arith.addi %7, %c1_i32 : i32
    %9 = arith.index_cast %8 : i32 to index
    %10 = memref.load %arg2[%9] : memref<4xf32, #tpu.memory_space<smem>>
    %c0 = arith.constant 0 : index
    %c0_2 = arith.constant 0 : index
    %c0_3 = arith.constant 0 : index
    %11 = vector.load %arg3[%c0, %c0_2, %c0_3] : memref<2x4x256xbf16, #tpu.memory_space<vmem>>, vector<1x4x256xbf16>
    %12 = vector.shape_cast %11 : vector<1x4x256xbf16> to vector<4x256xbf16>
    %c0_4 = arith.constant 0 : index
    %c0_5 = arith.constant 0 : index
    %c0_6 = arith.constant 0 : index
    %13 = vector.load %arg4[%c0_4, %c0_5, %c0_6] : memref<2x256x256xbf16, #tpu.memory_space<vmem>>, vector<1x256x256xbf16>
    %14 = vector.shape_cast %13 : vector<1x256x256xbf16> to vector<256x256xbf16>
    %cst = arith.constant dense<0.000000e+00> : vector<4x256xf32>
    %15 = tpu.matmul %12, %14, %cst {dimension_numbers = #tpu.dot_dimension_numbers<[1], [0], [0], [1], [0, 0, 1, 1], [], []>} : vector<4x256xbf16>, vector<256x256xbf16>, vector<4x256xf32> -> vector<4x256xf32>
    %c0_7 = arith.constant 0 : index
    %c0_8 = arith.constant 0 : index
    %16 = arith.index_cast %1 : i32 to index
    %17 = vector.load %arg3[%c0_7, %c0_8, %16] : memref<2x4x256xbf16, #tpu.memory_space<vmem>>, vector<1x4x256xbf16>
    %18 = vector.shape_cast %17 : vector<1x4x256xbf16> to vector<4x256xbf16>
    %19 = arith.extf %18 : vector<4x256xbf16> to vector<4x256xf32>
    %20 = vector.broadcast %6 : f32 to vector<4x256xf32>
    %21 = arith.mulf %20, %19 : vector<4x256xf32>
    %22 = vector.broadcast %10 : f32 to vector<4x256xf32>
    %23 = arith.addf %21, %22 : vector<4x256xf32>
    %24 = arith.addf %23, %15 : vector<4x256xf32>
    %c0_9 = arith.constant 0 : index
    %c0_10 = arith.constant 0 : index
    %c0_11 = arith.constant 0 : index
    %25 = vector.load %arg5[%c0_9, %c0_10, %c0_11] : memref<2x4x256xf32, #tpu.memory_space<vmem>>, vector<1x4x256xf32>
    %26 = vector.shape_cast %25 : vector<1x4x256xf32> to vector<4x256xf32>
    %27 = vector.shape_cast %24 : vector<4x256xf32> to vector<1x4x256xf32>
    tpu.vector_store %arg5[%c0_9, %c0_10, %c0_11], %27 {strides = array<i32>} : memref<2x4x256xf32, #tpu.memory_space<vmem>>, vector<1x4x256xf32>,
    %c2_i32_12 = arith.constant 2 : i32
    %28 = arith.muli %arg0, %c2_i32_12 : i32
    %c1_i32_13 = arith.constant 1 : i32
    %29 = arith.addi %28, %c1_i32_13 : i32
    %c2_i32_14 = arith.constant 2 : i32
    %30 = arith.muli %c2_i32_14, %29 : i32
    %31 = arith.index_cast %30 : i32 to index
    %32 = memref.load %arg2[%31] : memref<4xf32, #tpu.memory_space<smem>>
    %c2_i32_15 = arith.constant 2 : i32
    %33 = arith.muli %c2_i32_15, %29 : i32
    %c1_i32_16 = arith.constant 1 : i32
    %34 = arith.addi %33, %c1_i32_16 : i32
    %35 = arith.index_cast %34 : i32 to index
    %36 = memref.load %arg2[%35] : memref<4xf32, #tpu.memory_space<smem>>
    %c1 = arith.constant 1 : index
    %c0_17 = arith.constant 0 : index
    %c0_18 = arith.constant 0 : index
    %37 = vector.load %arg3[%c1, %c0_17, %c0_18] : memref<2x4x256xbf16, #tpu.memory_space<vmem>>, vector<1x4x256xbf16>
    %38 = vector.shape_cast %37 : vector<1x4x256xbf16> to vector<4x256xbf16>
    %c1_19 = arith.constant 1 : index
    %c0_20 = arith.constant 0 : index
    %c0_21 = arith.constant 0 : index
    %39 = vector.load %arg4[%c1_19, %c0_20, %c0_21] : memref<2x256x256xbf16, #tpu.memory_space<vmem>>, vector<1x256x256xbf16>
    %40 = vector.shape_cast %39 : vector<1x256x256xbf16> to vector<256x256xbf16>
    %cst_22 = arith.constant dense<0.000000e+00> : vector<4x256xf32>
    %41 = tpu.matmul %38, %40, %cst_22 {dimension_numbers = #tpu.dot_dimension_numbers<[1], [0], [0], [1], [0, 0, 1, 1], [], []>} : vector<4x256xbf16>, vector<256x256xbf16>, vector<4x256xf32> -> vector<4x256xf32>
    %c1_23 = arith.constant 1 : index
    %c0_24 = arith.constant 0 : index
    %42 = arith.index_cast %1 : i32 to index
    %43 = vector.load %arg3[%c1_23, %c0_24, %42] : memref<2x4x256xbf16, #tpu.memory_space<vmem>>, vector<1x4x256xbf16>
    %44 = vector.shape_cast %43 : vector<1x4x256xbf16> to vector<4x256xbf16>
    %45 = arith.extf %44 : vector<4x256xbf16> to vector<4x256xf32>
    %46 = vector.broadcast %32 : f32 to vector<4x256xf32>
    %47 = arith.mulf %46, %45 : vector<4x256xf32>
    %48 = vector.broadcast %36 : f32 to vector<4x256xf32>
    %49 = arith.addf %47, %48 : vector<4x256xf32>
    %50 = arith.addf %49, %41 : vector<4x256xf32>
    %c1_25 = arith.constant 1 : index
    %c0_26 = arith.constant 0 : index
    %c0_27 = arith.constant 0 : index
    %51 = vector.load %arg5[%c1_25, %c0_26, %c0_27] : memref<2x4x256xf32, #tpu.memory_space<vmem>>, vector<1x4x256xf32>
    %52 = vector.shape_cast %51 : vector<1x4x256xf32> to vector<4x256xf32>
    %53 = vector.shape_cast %50 : vector<4x256xf32> to vector<1x4x256xf32>
    tpu.vector_store %arg5[%c1_25, %c0_26, %c0_27], %53 {strides = array<i32>} : memref<2x4x256xf32, #tpu.memory_space<vmem>>, vector<1x4x256xf32>,
    return
  }
  func.func @transform_0(%arg0: i32, %arg1: i32, %arg2: memref<4xf32, #tpu.memory_space<smem>>) -> (i32, i32, i32) {
    %c0_i32 = arith.constant 0 : i32
    %c0_i32_0 = arith.constant 0 : i32
    %c0_i32_1 = arith.constant 0 : i32
    return %arg0, %c0_i32, %c0_i32_0 : i32, i32, i32
  }
  func.func @transform_1(%arg0: i32, %arg1: i32, %arg2: memref<4xf32, #tpu.memory_space<smem>>) -> (i32, i32, i32) {
    %c0_i32 = arith.constant 0 : i32
    %c0_i32_0 = arith.constant 0 : i32
    return %arg0, %c0_i32, %arg1 : i32, i32, i32
  }
  func.func @transform_2(%arg0: i32, %arg1: i32, %arg2: memref<4xf32, #tpu.memory_space<smem>>) -> (i32, i32, i32) {
    %c0_i32 = arith.constant 0 : i32
    %c0_i32_0 = arith.constant 0 : i32
    return %arg0, %c0_i32, %arg1 : i32, i32, i32
  }
}

</mosaic_0001>

<bundles_post_ra>
// kernel: sin.5
= control target key start
LH: loop header
LB: loop body
LE: loop exit
PB: predicated region body
PF: predicated region fallthrough
CT: control target
= control target key end

     0   :  { %v126_v12 = vmov 683565275   ;;  %v127_v14 = vmov 2475754826   ;;  %v128_v16 = vmov 2131351028   ;;  %s169_s0 = inlined_call_operand.vmem [shape: f32[2,7], index: 0, kind: input, shape index: {}]   ;;  %s170_s1 = inlined_call_operand.vmem [shape: f32[2,7], index: 1, kind: output, shape index: {}]  }
   0x1   :  { %v145_v0 = vld [vmem:[%s169_s0] sm:$0x3]  ;;  %v129_v18 = vmov 2102212464   ;;  %v130_v20 = vmov 920167782  }
   0x2   :  { %v6_v1 = vand.u32 2139095040, %v145_v0  ;;  %v3_v3 = vand.u32 2147483647, %v145_v0  ;;  %v131_v27 = vmov 1326507024   ;;  %vm5_vm7 = vcmp.lt.s32.totalorder %v145_v0, 0 }
   0x3   :  { %vm95_vm12 = vweird.f32 %v145_v0 }
   0x4   :  { %v7_v2 = vshrl.u32 %v6_v1, 23  ;;  %v10_v6 = vand.u32 8388607, %v3_v3  ;;  %vm4_vm8 = vcmp.le.f32.partialorder %v3_v3, 0.7853982 }
   0x6   :  { %v108_v4 = vadd.s32 4294967169, %v7_v2  ;;  %v11_v9 = vor.u32 8388608, %v10_v6 }
   0x8   :  { %v13_v5 = vadd.s32 1, %v108_v4  ;;  %v51_v29 = vshll.u32 %v11_v9, 8 }
   0xa   :  { %vm14_vm0 = vcmp.gt.s32.totalorder %v13_v5, 0 }
   0xb   :  { %v15_v7 = vsel %vm14_vm0, %v13_v5, 0 }
   0xc   :  { %v17_v8 = vand.u32 31, %v15_v7  ;;  %v16_v10 = vshrl.u32 %v15_v7, 5 }
   0xe   :  { %v18_v11 = vsub.s32 32, %v17_v8  ;;  %v20_v13 = vshll.u32 %v126_v12, %v17_v8  ;;  %v23_v15 = vshll.u32 %v127_v14, %v17_v8  ;;  %v26_v17 = vshll.u32 %v128_v16, %v17_v8 }
   0xf   :  { %v29_v19 = vshll.u32 %v129_v18, %v17_v8  ;;  %v32_v21 = vshll.u32 %v130_v20, %v17_v8  ;;  %vm35_vm1 = vcmp.lt.s32.totalorder %v16_v10, 1  ;;  %vm38_vm2 = vcmp.lt.s32.totalorder %v16_v10, 4 }
  0x10   :  { %v19_v22 = vshrl.u32 %v126_v12, %v18_v11  ;;  %v21_v23 = vshrl.u32 %v127_v14, %v18_v11  ;;  %v24_v24 = vshrl.u32 %v128_v16, %v18_v11  ;;  %v27_v25 = vshrl.u32 %v129_v18, %v18_v11 }
  0x11   :  { %v30_v26 = vshrl.u32 %v130_v20, %v18_v11  ;;  %v33_v28 = vshrl.u32 %v131_v27, %v18_v11  ;;  %vm36_vm3 = vcmp.lt.s32.totalorder %v16_v10, 2  ;;  %vm37_vm4 = vcmp.lt.s32.totalorder %v16_v10, 3 }
  0x12   :  { %v22_v30 = vor.u32 %v21_v23, %v20_v13  ;;  %v25_v31 = vor.u32 %v24_v24, %v23_v15  ;;  %v28_v32 = vor.u32 %v27_v25, %v26_v17 }
  0x13   :  { %v31_v33 = vor.u32 %v30_v26, %v29_v19  ;;  %v34_v34 = vor.u32 %v33_v28, %v32_v21 }
  0x14   :  { %v39_v35 = vsel %vm35_vm1, %v19_v22, %v22_v30  ;;  %v40_v36 = vsel %vm38_vm2, %v28_v32, 2102212464  ;;  %v43_v37 = vsel %vm35_vm1, %v22_v30, %v25_v31  ;;  %v47_v38 = vsel %vm35_vm1, %v25_v31, %v28_v32 }
  0x15   :  { %v41_v39 = vsel %vm37_vm4, %v25_v31, %v40_v36  ;;  %v44_v40 = vsel %vm38_vm2, %v31_v33, 920167782  ;;  %v48_v41 = vsel %vm38_vm2, %v34_v34, 1326507024 }
  0x16   :  { %v45_v42 = vsel %vm37_vm4, %v28_v32, %v44_v40  ;;  %v49_v43 = vsel %vm37_vm4, %v31_v33, %v48_v41  ;;  %v42_v44 = vsel %vm36_vm3, %v39_v35, %v41_v39 }
  0x17   :  { %v46_v45 = vsel %vm36_vm3, %v43_v37, %v45_v42  ;;  %v50_v46 = vsel %vm36_vm3, %v47_v38, %v49_v43  ;;  %v58_v51 = vmul.u32 %v51_v29, %v42_v44 }
  0x18   :  { %v151_v47 = vmul.u32.u64.low %v51_v29, %v50_v46  ;;  %v152_v48 = vmul.u32.u64.high %v51_v29, %v50_v46, %v151_v47  ;;  %v154_v49 = vmul.u32.u64.low %v51_v29, %v46_v45  ;;  %v155_v50 = vmul.u32.u64.high %v51_v29, %v46_v45, %v154_v49 }
  0x1a   :  { %vm60_vm5 = vc.u32 %v152_v48, %v154_v49  ;;  %v61_v52 = vadd.s32 1, %v155_v50  ;;  %v59_v63 = vadd.s32 %v154_v49, %v152_v48 }
  0x1c   :  { %v62_v53 = vsel %vm60_vm5, %v61_v52, %v155_v50 }
  0x1d   :  { %v63_v54 = vadd.s32 %v62_v53, %v58_v51 }
  0x1f   :  { %v64_v55 = vadd.s32 536870912, %v63_v54 }
  0x21   :  { %v65_v56 = vshrl.u32 %v64_v55, 30 }
  0x23   :  { %v66_v57 = vshll.u32 %v65_v56, 30  ;;  %v89_v13 = vsub.s32 4, %v65_v56 }
  0x25   :  { %v67_v58 = vsub.s32 %v63_v54, %v66_v57  ;;  %v90_v15 = vsel %vm5_vm7, %v89_v13, %v65_v56 }
  0x26   :  { %v92_v18 = vsel %vm4_vm8, 0, %v90_v15 }
  0x27   :  { %v69_v59 = vsub.s32 0, %v67_v58  ;;  %v96_v19 = vadd.s32 3, %v92_v18 }
  0x29   :  { %v109_v60 = vmin.u32 %v69_v59, %v67_v58  ;;  %v97_v20 = vand.u32 3, %v96_v19 }
  0x2b   :  { %v71_v61 = vclz %v109_v60  ;;  %vm102_vm9 = vcmp.eq.s32.totalorder %v97_v20, 2  ;;  %vm99_vm10 = vcmp.eq.s32.totalorder %v97_v20, 0  ;;  %vm98_vm11 = vcmp.lt.s32.totalorder %v97_v20, 2 }
  0x2d   :  { %v110_v62 = vadd.s32 4294967294, %v71_v61 }
  0x2f   :  { %vm111_vm6 = vcmp.lt.s32.totalorder %v110_v62, 0 }
  0x30   :  { %v74_v1 = vsel %vm111_vm6, 0, %v110_v62 }
  0x31   :  { %v75_v2 = vsub.s32 32, %v74_v1  ;;  %v76_v4 = vshll.u32 %v67_v58, %v74_v1  ;;  %v79_v5 = vsub.s32 4294967266, %v74_v1 }
  0x33   :  { %v77_v6 = vshrl.u32 %v59_v63, %v75_v2  ;;  %v80_v7 = vadd.s32 127, %v79_v5 }
  0x35   :  { %v78_v8 = vor.u32 %v77_v6, %v76_v4  ;;  %v81_v9 = vshll.u32 %v80_v7, 23 }
  0x37   :  { %v82_v10 = vor.u32 4788187, %v81_v9  ;;  %v85_v11 = vcvt.s32.f32 %v78_v8 }
  0x39   :  { %v83_v12 = vand.u32 2147483647, %v82_v10 }
  0x3b   :  { %v86_v14 = vmul.f32 %v85_v11, %v83_v12 }
  0x3d   :  { %v87_v3 = vxor.u32 2147483648, %v86_v14 }
  0x3f   :  { %v88_v16 = vsel %vm5_vm7, %v87_v3, %v86_v14 }
  0x40   :  { %v91_v17 = vsel %vm4_vm8, %v145_v0, %v88_v16 }
  0x41   :  { %122 = vcosq.f32 %v91_v17 }
  0x42   :  { %124 = vsinq.f32 %v91_v17 }
  0x4b   :  { %v123_v21 = vpop.eup %122 }
  0x4c   :  { %v125_v22 = vpop.eup %124  ;;  %v103_v23 = vxor.u32 2147483648, %v123_v21 }
  0x4d   :  { %v100_v24 = vxor.u32 2147483648, %v125_v22 }
  0x4e   :  { %v104_v0 = vsel %vm102_vm9, %v103_v23, %v125_v22 }
  0x4f   :  { %v101_v25 = vsel %vm99_vm10, %v123_v21, %v100_v24 }
  0x50   :  { %v105_v26 = vsel %vm98_vm11, %v101_v25, %v104_v0 }
  0x51   :  { %v106_v27 = vsel %vm95_vm12, nan, %v105_v26 }
  0x52   :  { %107 = vst [vmem:[%s170_s1] sm:$0x3] %v106_v27 }

// kernel: neg.4
= control target key start
LH: loop header
LB: loop body
LE: loop exit
PB: predicated region body
PF: predicated region fallthrough
CT: control target
= control target key end

     0   :  { %s24_s0 = inlined_call_operand.vmem [shape: f32[2,7], index: 0, kind: input, shape index: {}]   ;;  %s25_s1 = inlined_call_operand.vmem [shape: f32[2,7], index: 1, kind: output, shape index: {}]  }
   0x1   :  { %v2_v0 = vld [vmem:[%s24_s0] sm:$0x3] }
   0x2   :  { %v5_v1 = vxor.u32 2147483648, %v2_v0 }
   0x4   :  { %7 = vst [vmem:[%s25_s1] sm:$0x3] %v5_v1 }

// kernel: _da_mixed_op_impl.1
= control target key start
LH: loop header
LB: loop body
LE: loop exit
PB: predicated region body
PF: predicated region fallthrough
CT: control target
= control target key end

     0   :  { %s1008_s0 = inlined_call_operand.vmem [shape: f32[4], index: 0, kind: input, shape index: {}]   ;;  %s1009_s1 = inlined_call_operand.vmem [shape: bf16[2,4,256], index: 1, kind: input, shape index: {}]   ;;  %s1010_s2 = inlined_call_operand.vmem [shape: bf16[2,256,256], index: 2, kind: input, shape index: {}]   ;;  %s1011_s3 = inlined_call_operand.vmem [shape: f32[2,4,256], index: 3, kind: output, shape index: {}]  }
   0x1   :  { %s8_s14 = sshll.u32 %s1008_s0, 4  ;;  %s9_s14 = int_to_ptr.vmem [resolvable:$true] %s8_s14 }
   0x2   :  { %s763_s15 = scalar_lea.vmem %s9_s14, 16  ;;  %p768_p1 = scmp.lt.s32.totalorder %s9_s14, %s9_s14 }
   0x3   :  { %p764_p0 = scmp.ne.s32.totalorder %s9_s14, %s763_s15  ;;  %p769_p2 = scmp.lt.s32.totalorder %s763_s15, %s763_s15 }
   0x5   :  { %p770_p3 = por %p769_p2, %p768_p1 }
   0x7   :  { %p771_p4 = pnand %p770_p3, %p764_p0 }
   0x9   :  { %774 = shalt.err (!%p771_p4)  }
   0xa   :  { %s777_s16 = smov [#allocation3]  }
   0xb   :  { %11 = dma.vmem_to_smem %s9_s14, 16, %s777_s16, [#allocation2] }
   0xc   :  { %775 = dma.done.wait [#allocation2], 16 }
   0xd   :  { %776 = vsyncadd [#allocation2], 4294967280 }
   0xe   :  { %13 = sfence }
   0xf   :  { %v667_v0 = vld [vmem:[%s1010_s2 + $0x4] ss:$8 sps:$4 sm:$0xff]   ;;  %v671_v2 = vld [vmem:[%s1010_s2] ss:$8 sps:$4 sm:$0xff]   ;;  %v673_v4 = vld [vmem:[%s1010_s2 + $0x14] ss:$8 sps:$4 sm:$0xff]  }
  0x10   :  { %v669_v1 = vld [vmem:[%s1010_s2 + $0x104] ss:$8 sps:$4 sm:$0xff]   ;;  %227 = vmatprep.subr.bf16.mxu0 %v667_v0  ;;  %v672_v3 = vld [vmem:[%s1010_s2 + $0x100] ss:$8 sps:$4 sm:$0xff]   ;;  %v675_v5 = vld [vmem:[%s1010_s2 + $0x114] ss:$8 sps:$4 sm:$0xff]  }
  0x11   :  { %496 = vmatprep.subr.bf16.mxu1 %v669_v1  ;;  %228 = vmatpush1.bf16.msra.mxu0 %v671_v2  ;;  %v677_v6 = vld [vmem:[%s1010_s2 + $0x10] ss:$8 sps:$4 sm:$0xff]   ;;  %v679_v8 = vld [vmem:[%s1010_s2 + $0x24] ss:$8 sps:$4 sm:$0xff]   ;;  %v683_v10 = vld [vmem:[%s1010_s2 + $0x20] ss:$8 sps:$4 sm:$0xff]  }
  0x12   :  { %497 = vmatpush1.bf16.msra.mxu1 %v672_v3  ;;  %229 = vmatprep.subr.bf16.mxu0 %v673_v4  ;;  %v678_v7 = vld [vmem:[%s1010_s2 + $0x110] ss:$8 sps:$4 sm:$0xff]   ;;  %v681_v9 = vld [vmem:[%s1010_s2 + $0x124] ss:$8 sps:$4 sm:$0xff]   ;;  %v684_v11 = vld [vmem:[%s1010_s2 + $0x120] ss:$8 sps:$4 sm:$0xff]  }
  0x13   :  { %498 = vmatprep.subr.bf16.mxu1 %v675_v5  ;;  %v685_v12 = vld [vmem:[%s1010_s2 + $0x34] ss:$8 sps:$4 sm:$0xff]   ;;  %v689_v14 = vld [vmem:[%s1010_s2 + $0x30] ss:$8 sps:$4 sm:$0xff]   ;;  %v691_v16 = vld [vmem:[%s1010_s2 + $0x44] ss:$8 sps:$4 sm:$0xff]  }
  0x14   :  { %v687_v13 = vld [vmem:[%s1010_s2 + $0x134] ss:$8 sps:$4 sm:$0xff]   ;;  %v690_v15 = vld [vmem:[%s1010_s2 + $0x130] ss:$8 sps:$4 sm:$0xff]   ;;  %v693_v17 = vld [vmem:[%s1010_s2 + $0x144] ss:$8 sps:$4 sm:$0xff]  }
  0x15   :  { %230 = vmatpush1.bf16.msra.mxu0 %v677_v6  ;;  %v695_v18 = vld [vmem:[%s1010_s2 + $0x40] ss:$8 sps:$4 sm:$0xff]   ;;  %v697_v20 = vld [vmem:[%s1010_s2 + $0x54] ss:$8 sps:$4 sm:$0xff]   ;;  %v701_v22 = vld [vmem:[%s1010_s2 + $0x50] ss:$8 sps:$4 sm:$0xff]  }
  0x16   :  { %499 = vmatpush1.bf16.msra.mxu1 %v678_v7  ;;  %231 = vmatprep.subr.bf16.mxu0 %v679_v8  ;;  %v696_v19 = vld [vmem:[%s1010_s2 + $0x140] ss:$8 sps:$4 sm:$0xff]   ;;  %v699_v21 = vld [vmem:[%s1010_s2 + $0x154] ss:$8 sps:$4 sm:$0xff]   ;;  %v702_v23 = vld [vmem:[%s1010_s2 + $0x150] ss:$8 sps:$4 sm:$0xff]  }
  0x17   :  { %500 = vmatprep.subr.bf16.mxu1 %v681_v9  ;;  %v703_v24 = vld [vmem:[%s1010_s2 + $0x64] ss:$8 sps:$4 sm:$0xff]   ;;  %v707_v26 = vld [vmem:[%s1010_s2 + $0x60] ss:$8 sps:$4 sm:$0xff]   ;;  %v709_v28 = vld [vmem:[%s1010_s2 + $0x74] ss:$8 sps:$4 sm:$0xff]  }
  0x18   :  { %v705_v25 = vld [vmem:[%s1010_s2 + $0x164] ss:$8 sps:$4 sm:$0xff]   ;;  %v708_v27 = vld [vmem:[%s1010_s2 + $0x160] ss:$8 sps:$4 sm:$0xff]   ;;  %v711_v29 = vld [vmem:[%s1010_s2 + $0x174] ss:$8 sps:$4 sm:$0xff]  }
  0x19   :  { %232 = vmatpush1.bf16.msra.mxu0 %v683_v10  ;;  %v713_v30 = vld [vmem:[%s1010_s2 + $0x70] ss:$8 sps:$4 sm:$0xff]   ;;  %v715_v32 = vld [vmem:[%s1010_s2 + $0x84] ss:$8 sps:$4 sm:$0xff]   ;;  %v719_v34 = vld [vmem:[%s1010_s2 + $0x80] ss:$8 sps:$4 sm:$0xff]  }
  0x1a   :  { %501 = vmatpush1.bf16.msra.mxu1 %v684_v11  ;;  %233 = vmatprep.subr.bf16.mxu0 %v685_v12  ;;  %v714_v31 = vld [vmem:[%s1010_s2 + $0x170] ss:$8 sps:$4 sm:$0xff]   ;;  %v717_v33 = vld [vmem:[%s1010_s2 + $0x184] ss:$8 sps:$4 sm:$0xff]   ;;  %v720_v35 = vld [vmem:[%s1010_s2 + $0x180] ss:$8 sps:$4 sm:$0xff]  }
  0x1b   :  { %502 = vmatprep.subr.bf16.mxu1 %v687_v13  ;;  %v721_v36 = vld [vmem:[%s1010_s2 + $0x94] ss:$8 sps:$4 sm:$0xff]   ;;  %v725_v38 = vld [vmem:[%s1010_s2 + $0x90] ss:$8 sps:$4 sm:$0xff]   ;;  %v727_v40 = vld [vmem:[%s1010_s2 + $0xa4] ss:$8 sps:$4 sm:$0xff]  }
  0x1c   :  { %v723_v37 = vld [vmem:[%s1010_s2 + $0x194] ss:$8 sps:$4 sm:$0xff]   ;;  %v726_v39 = vld [vmem:[%s1010_s2 + $0x190] ss:$8 sps:$4 sm:$0xff]   ;;  %v729_v41 = vld [vmem:[%s1010_s2 + $0x1a4] ss:$8 sps:$4 sm:$0xff]  }
  0x1d   :  { %234 = vmatpush1.bf16.msra.mxu0 %v689_v14  ;;  %v731_v42 = vld [vmem:[%s1010_s2 + $0xa0] ss:$8 sps:$4 sm:$0xff]   ;;  %v733_v44 = vld [vmem:[%s1010_s2 + $0xb4] ss:$8 sps:$4 sm:$0xff]   ;;  %v737_v46 = vld [vmem:[%s1010_s2 + $0xb0] ss:$8 sps:$4 sm:$0xff]  }
  0x1e   :  { %503 = vmatpush1.bf16.msra.mxu1 %v690_v15  ;;  %235 = vmatprep.subr.bf16.mxu0 %v691_v16  ;;  %v732_v43 = vld [vmem:[%s1010_s2 + $0x1a0] ss:$8 sps:$4 sm:$0xff]   ;;  %v735_v45 = vld [vmem:[%s1010_s2 + $0x1b4] ss:$8 sps:$4 sm:$0xff]   ;;  %v738_v48 = vld [vmem:[%s1010_s2 + $0x1b0] ss:$8 sps:$4 sm:$0xff]  }
  0x1f   :  { %504 = vmatprep.subr.bf16.mxu1 %v693_v17  ;;  %v563_v47 = vld.sshfl [vmem:[%s1009_s1] sm:$0x33 pattern:$0x76325410]  ;;  %v739_v51 = vld [vmem:[%s1010_s2 + $0xc4] ss:$8 sps:$4 sm:$0xff]  }
  0x20   :  { %v64_v49 = vcombine.high %v563_v47, %v563_v47  ;;  %v631_v50 = vld.sshfl [vmem:[%s1009_s1 + $0x4] sm:$0x33 pattern:$0x76325410]  ;;  %v743_v54 = vld [vmem:[%s1010_s2 + $0xc0] ss:$8 sps:$4 sm:$0xff]  }
  0x21   :  { %236 = vmatpush1.bf16.msra.mxu0 %v695_v18  ;;  %v741_v52 = vld [vmem:[%s1010_s2 + $0x1c4] ss:$8 sps:$4 sm:$0xff]   ;;  %v333_v53 = vcombine.high %v631_v50, %v631_v50  ;;  %v744_v55 = vld [vmem:[%s1010_s2 + $0x1c0] ss:$8 sps:$4 sm:$0xff]   ;;  %v745_v56 = vld [vmem:[%s1010_s2 + $0xd4] ss:$8 sps:$4 sm:$0xff]  }
  0x22   :  { %505 = vmatpush1.bf16.msra.mxu1 %v696_v19  ;;  %237 = vmatprep.subr.bf16.mxu0 %v697_v20  ;;  %v747_v57 = vld [vmem:[%s1010_s2 + $0x1d4] ss:$8 sps:$4 sm:$0xff]   ;;  %v749_v58 = vld [vmem:[%s1010_s2 + $0xd0] ss:$8 sps:$4 sm:$0xff]   ;;  %v751_v60 = vld [vmem:[%s1010_s2 + $0xe4] ss:$8 sps:$4 sm:$0xff]  }
  0x23   :  { %506 = vmatprep.subr.bf16.mxu1 %v699_v21  ;;  %259 = vmatprep.mubr.bf16.mxu0 %v64_v49  ;;  %v750_v59 = vld [vmem:[%s1010_s2 + $0x1d0] ss:$8 sps:$4 sm:$0xff]   ;;  %v753_v61 = vld [vmem:[%s1010_s2 + $0x1e4] ss:$8 sps:$4 sm:$0xff]   ;;  %v755_v62 = vld [vmem:[%s1010_s2 + $0xe0] ss:$8 sps:$4 sm:$0xff]  }
  0x24   :  { %528 = vmatprep.mubr.bf16.mxu1 %v333_v53  ;;  %v756_v63 = vld [vmem:[%s1010_s2 + $0x1e0] ss:$8 sps:$4 sm:$0xff]   ;;  %v757_v0 = vld [vmem:[%s1010_s2 + $0xf4] ss:$8 sps:$4 sm:$0xff]   ;;  %v761_v2 = vld [vmem:[%s1010_s2 + $0xf0] ss:$8 sps:$4 sm:$0xff]  }
  0x25   :  { %238 = vmatpush1.bf16.msra.mxu0 %v701_v22  ;;  %v759_v1 = vld [vmem:[%s1010_s2 + $0x1f4] ss:$8 sps:$4 sm:$0xff]   ;;  %v762_v3 = vld [vmem:[%s1010_s2 + $0x1f0] ss:$8 sps:$4 sm:$0xff]   ;;  %s20_s9 = sld [smem:[#allocation3]]  ;;  %s596_s10 = sld [smem:[#allocation3 + $0x2]] }
  0x26   :  { %507 = vmatpush1.bf16.msra.mxu1 %v702_v23  ;;  %239 = vmatprep.subr.bf16.mxu0 %v703_v24  ;;  %s562_s11 = sld [smem:[#allocation3 + $0x1]]  ;;  %v272_v4 = vld [vmem:[%s1009_s1] sm:$0xff]   ;;  %s597_s14 = sld [smem:[#allocation3 + $0x3]] }
  0x27   :  { %508 = vmatprep.subr.bf16.mxu1 %v705_v25  ;;  %v273_v5 = vunpack.c.l.bf16 %v272_v4  ;;  %v541_v6 = vunpack.c.h.bf16 %v272_v4 }
  0x29   :  { %240 = vmatpush1.bf16.msra.mxu0 %v707_v26 }
  0x2a   :  { %509 = vmatpush1.bf16.msra.mxu1 %v708_v27  ;;  %241 = vmatprep.subr.bf16.mxu0 %v709_v28 }
  0x2b   :  { %510 = vmatprep.subr.bf16.mxu1 %v711_v29  ;;  %v274_v7 = vstv %s20_s9  ;;  %v542_v8 = vstv %s596_s10 }
  0x2c   :  { %v275_v9 = vmul.f32 %v274_v7, %v273_v5  ;;  %v543_v10 = vmul.f32 %v542_v8, %v541_v6  ;;  %v276_v11 = vstv %s562_s11  ;;  %v544_v12 = vstv %s597_s14 }
  0x2d   :  { %242 = vmatpush1.bf16.msra.mxu0 %v713_v30 }
  0x2e   :  { %511 = vmatpush1.bf16.msra.mxu1 %v714_v31  ;;  %243 = vmatprep.subr.bf16.mxu0 %v715_v32  ;;  %v277_v15 = vadd.f32 %v276_v11, %v275_v9  ;;  %v545_v16 = vadd.f32 %v544_v12, %v543_v10 }
  0x2f   :  { %512 = vmatprep.subr.bf16.mxu1 %v717_v33 }
  0x31   :  { %244 = vmatpush1.bf16.msra.mxu0 %v719_v34 }
  0x32   :  { %513 = vmatpush1.bf16.msra.mxu1 %v720_v35  ;;  %245 = vmatprep.subr.bf16.mxu0 %v721_v36 }
  0x33   :  { %514 = vmatprep.subr.bf16.mxu1 %v723_v37 }
  0x35   :  { %246 = vmatpush1.bf16.msra.mxu0 %v725_v38 }
  0x36   :  { %515 = vmatpush1.bf16.msra.mxu1 %v726_v39  ;;  %247 = vmatprep.subr.bf16.mxu0 %v727_v40 }
  0x37   :  { %516 = vmatprep.subr.bf16.mxu1 %v729_v41 }
  0x39   :  { %248 = vmatpush1.bf16.msra.mxu0 %v731_v42 }
  0x3a   :  { %517 = vmatpush1.bf16.msra.mxu1 %v732_v43  ;;  %249 = vmatprep.subr.bf16.mxu0 %v733_v44 }
  0x3b   :  { %518 = vmatprep.subr.bf16.mxu1 %v735_v45 }
  0x3d   :  { %250 = vmatpush1.bf16.msra.mxu0 %v737_v46 }
  0x3e   :  { %519 = vmatpush1.bf16.msra.mxu1 %v738_v48  ;;  %251 = vmatprep.subr.bf16.mxu0 %v739_v51 }
  0x3f   :  { %520 = vmatprep.subr.bf16.mxu1 %v741_v52 }
  0x41   :  { %252 = vmatpush1.bf16.msra.mxu0 %v743_v54 }
  0x42   :  { %521 = vmatpush1.bf16.msra.mxu1 %v744_v55  ;;  %253 = vmatprep.subr.bf16.mxu0 %v745_v56 }
  0x43   :  { %522 = vmatprep.subr.bf16.mxu1 %v747_v57 }
  0x45   :  { %254 = vmatpush1.bf16.msra.mxu0 %v749_v58 }
  0x46   :  { %523 = vmatpush1.bf16.msra.mxu1 %v750_v59  ;;  %255 = vmatprep.subr.bf16.mxu0 %v751_v60 }
  0x47   :  { %524 = vmatprep.subr.bf16.mxu1 %v753_v61 }
  0x49   :  { %256 = vmatpush1.bf16.msra.mxu0 %v755_v62 }
  0x4a   :  { %525 = vmatpush1.bf16.msra.mxu1 %v756_v63  ;;  %257 = vmatprep.subr.bf16.mxu0 %v757_v0 }
  0x4b   :  { %526 = vmatprep.subr.bf16.mxu1 %v759_v1 }
  0x4d   :  { %258 = vmatpush1.bf16.msra.mxu0 %v761_v2 }
  0x4e   :  { %527 = vmatpush1.bf16.msra.mxu1 %v762_v3 }
  0x50   :  { %260 = vmatmul.mubr.bf16.vlgmr.msra.gmra.mrb[0].mxu0 %v563_v47 }
  0x51   :  { %529 = vmatmul.mubr.bf16.vlgmr.msra.gmra.mrb[0].mxu1 %v631_v50 }
 0x123   :  { %v261_v13 = vpop.f32.mrb[0].mxu0 }
 0x124   :  { %v530_v14 = vpop.f32.mrb[0].mxu1  ;;  %v263_v17 = vpop.f32.mrb[1].mxu0 }
 0x125   :  { %v532_v18 = vpop.f32.mrb[1].mxu1  ;;  %v280_v19 = vcombine.low %v261_v13, %v263_v17  ;;  %v265_v21 = vpop.f32.mrb[2].mxu0 }
 0x126   :  { %v548_v20 = vcombine.low %v530_v14, %v532_v18  ;;  %v534_v22 = vpop.f32.mrb[2].mxu1  ;;  %v266_v23 = vpop.f32.mrb[3].mxu0 }
 0x127   :  { %v535_v24 = vpop.f32.mrb[3].mxu1  ;;  %v282_v25 = vadd.f32 %v280_v19, %v277_v15 }
 0x128   :  { %v550_v26 = vadd.f32 %v548_v20, %v545_v16 }
 0x129   :  { %283 = vst [vmem:[%s1011_s3] sm:$0xff] %v282_v25 }
 0x12a   :  { %665 = vst [vmem:[%s1011_s3 + $0x8] sm:$0xff] %v550_v26 }

</bundles_post_ra>
